<compile_context>
chip_gen: v7x
topology: tpu7x:2x2x1
jax: 0.10.0
libtpu: 0.0.40
codegen_flags: <defaults>
</compile_context>

<pallas_src>
import functools

import jax
import jax.numpy as jnp
from jax.experimental import pallas as pl
from jax.experimental.pallas import tpu as pltpu


def _round_up(x, m):
    return ((x + m - 1) // m) * m


def _logreg_kernel(xt_ref, w1_ref, b1_ref, c2_ref, ot_ref, *, D, N, O):
    # xt: (D, Bt) f32 -- batch on lanes.
    xt = xt_ref[...]

    # --- bilinear1(x, x) ----------------------------------------------------------
    # t1[n*D + i, b] = sum_j W1[n, i, j] * x[b, j]     (single MXU dot, lane-dense)
    t1 = jnp.dot(w1_ref[...], xt, preferred_element_type=jnp.float32)   # (N*D, Bt)

    # h_n = sum_i x[b, i] * t1[n*D + i, b] + b1[n]
    # (VPU mul + XLU sublane-reduce on lane-dense (D, Bt) tiles; b1 splat from SMEM)
    h = []
    for n in range(N):
        hn = jnp.sum(t1[n * D:(n + 1) * D, :] * xt, axis=0, keepdims=True)  # (1, Bt)
        h.append(hn + b1_ref[0, n])

    # --- bilinear2(h, h) -> z, fully on the VPU with SMEM-scalar coefficients -----
    # c2_ref rows 0..T-1 hold symmetric-folded coefficients (W2[:,i,j] + W2[:,j,i]
    # for i<j, W2[:,i,i] on the diagonal); row T holds b2.  T = N(N+1)/2.
    T = N * (N + 1) // 2
    prods = []
    for i in range(N):
        for j in range(i, N):
            prods.append(h[i] * h[j])                                    # (1, Bt)

    rows = []
    for o in range(O):
        z_o = prods[0] * c2_ref[0, o] + c2_ref[T, o]                     # (1, Bt)
        for k in range(1, T):
            z_o = z_o + prods[k] * c2_ref[k, o]
        rows.append(z_o)
    z = jnp.concatenate(rows, axis=0)                                    # (O, Bt)

    # --- sigmoid (exact f32; divide is cheap now that z is lane-dense) ------------
    ot_ref[...] = (1.0 / (1.0 + jnp.exp(-z))).astype(ot_ref.dtype)


def prepare_params(w1, b1, w2, b2):
    """One-time, model-load-time packing of the Bilinear parameters.

    w1: (N, D, D), b1: (N,), w2: (O, N, N), b2: (O,)  ->  (w1m, b1m, c2b)
      w1m[n*D + i, j] = W1[n, i, j]                       shape (N*D, D)
      b1m                                                 shape (1, N)    [SMEM]
      c2b rows 0..T-1 = folded symmetric W2 coeffs,
          row T       = b2                                shape (T+1, O)  [SMEM]
    """
    N, D, _ = w1.shape
    O = w2.shape[0]

    w1m = w1.reshape(N * D, D).astype(jnp.float32)                       # (N*D, D)
    b1m = b1.reshape(1, N).astype(jnp.float32)

    rows = []
    for i in range(N):
        for j in range(i, N):
            c = w2[:, i, i] if i == j else w2[:, i, j] + w2[:, j, i]
            rows.append(c)
    rows.append(b2)
    c2b = jnp.stack(rows, axis=0).astype(jnp.float32)                    # (T+1, O)
    return w1m, b1m, c2b


@functools.partial(jax.jit, static_argnames=("block_b",))
def logistic_regression_forward(x, w1m, b1m, c2b, block_b=8192):
    """x: (B, D) f32; packed params from prepare_params(). Returns (B, O) sigmoid out."""
    B, D = x.shape
    N = b1m.shape[1]
    O = c2b.shape[1]

    # Batch tile: as large as possible (step-overhead amortization); lane dim must
    # be a multiple of 128 or the full batch.
    bt = min(B, block_b)
    # v7x has 2 TensorCores: for large batches make sure the "parallel" batch axis
    # has >= 2 blocks so both TCs get work, without shrinking below the
    # overhead-amortizing size.  No-op for small/demo batches and on v5e/v6e.
    if B > 2048 and pl.cdiv(B, bt) < 2:
        bt = _round_up(pl.cdiv(B, 2), 128)

    grid = (pl.cdiv(B, bt),)

    xt = x.T                                           # (D, B): batch on lanes

    kernel = functools.partial(_logreg_kernel, D=D, N=N, O=O)
    out_t = pl.pallas_call(
        kernel,
        out_shape=jax.ShapeDtypeStruct((O, B), x.dtype),
        grid=grid,
        in_specs=[
            pl.BlockSpec((D, bt), lambda i: (0, i)),            # x^T: tiled over batch
            pl.BlockSpec(w1m.shape, lambda i: (0, 0)),          # W1 slab: VMEM-resident
            pl.BlockSpec(memory_space=pltpu.MemorySpace.SMEM),  # b1: scalars in SMEM
            pl.BlockSpec(memory_space=pltpu.MemorySpace.SMEM),  # folded c2 + b2 in SMEM
        ],
        out_specs=pl.BlockSpec((O, bt), lambda i: (0, i)),      # lane-dense (O, Bt) store
        compiler_params=pltpu.CompilerParams(
            dimension_semantics=("parallel",)),                 # megacore / v7x 2-TC
    )(xt, w1m, b1m, c2b)

    return out_t.T                                     # back to (B, O)


def _reference(x, w1, b1, w2, b2):
    h = jnp.einsum('bi,nij,bj->bn', x, w1, x) + b1
    z = jnp.einsum('bi,oij,bj->bo', h, w2, h) + b2
    return jax.nn.sigmoid(z)


if __name__ == "__main__":
    # Small shapes consistent with the module: input_size=16, output_size=3, neuron=2, batch=8.
    B, D, N, O = 8, 16, 2, 3
    key = jax.random.PRNGKey(0)
    kx, kw1, kb1, kw2, kb2 = jax.random.split(key, 5)

    x = jax.random.normal(kx, (B, D), dtype=jnp.float32)

    # Deterministic init matching torch.nn.Bilinear's uniform(-1/sqrt(in1), 1/sqrt(in1)).
    bound1 = 1.0 / (D ** 0.5)
    w1 = jax.random.uniform(kw1, (N, D, D), jnp.float32, -bound1, bound1)
    b1 = jax.random.uniform(kb1, (N,), jnp.float32, -bound1, bound1)
    bound2 = 1.0 / (N ** 0.5)
    w2 = jax.random.uniform(kw2, (O, N, N), jnp.float32, -bound2, bound2)
    b2 = jax.random.uniform(kb2, (O,), jnp.float32, -bound2, bound2)

    # One-time parameter packing (hoisted out of the per-call path).
    w1m, b1m, c2b = prepare_params(w1, b1, w2, b2)

    out = jax.block_until_ready(logistic_regression_forward(x, w1m, b1m, c2b))
    ref = jax.block_until_ready(_reference(x, w1, b1, w2, b2))

    assert out.shape == (B, O), out.shape
    assert jnp.allclose(out, ref, rtol=1e-5, atol=1e-5), "mismatch vs reference"
    print("KERNEL_OK")
</pallas_src>

<mosaic_0001>
module attributes {stable_mosaic.version = 11 : i64} {
  func.func @_logreg_kernel(%arg0: i32, %arg1: memref<16x8xf32, #tpu.memory_space<vmem>>, %arg2: memref<32x16xf32, #tpu.memory_space<vmem>>, %arg3: memref<1x2xf32, #tpu.memory_space<smem>>, %arg4: memref<4x3xf32, #tpu.memory_space<smem>>, %arg5: memref<3x8xf32, #tpu.memory_space<vmem>>) attributes {dimension_semantics = [#tpu.dimension_semantics<parallel>], iteration_bounds = array<i64: 1>, scalar_prefetch = 0 : i64, scratch_operands = 0 : i64, tpu.core_type = #tpu.core_type<tc>, window_params = [{transform_indices = @transform_0, window_bounds = array<i64: 16, 8>}, {pipeline_mode = #tpu.pipeline_mode<synchronous>, transform_indices = @transform_1, window_bounds = array<i64: 32, 16>}, {transform_indices = @transform_2, window_bounds = array<i64: 1, 2>}, {transform_indices = @transform_3, window_bounds = array<i64: 4, 3>}, {transform_indices = @transform_4, window_bounds = array<i64: 3, 8>}]} {
    %c0 = arith.constant 0 : index
    %c0_0 = arith.constant 0 : index
    %0 = vector.load %arg1[%c0, %c0_0] : memref<16x8xf32, #tpu.memory_space<vmem>>, vector<16x8xf32>
    %c0_1 = arith.constant 0 : index
    %c0_2 = arith.constant 0 : index
    %1 = vector.load %arg2[%c0_1, %c0_2] : memref<32x16xf32, #tpu.memory_space<vmem>>, vector<32x16xf32>
    %cst = arith.constant dense<0.000000e+00> : vector<32x8xf32>
    %2 = tpu.matmul %1, %0, %cst {dimension_numbers = #tpu.dot_dimension_numbers<[1], [0], [0], [1], [0, 0, 1, 1], [], []>} : vector<32x16xf32>, vector<16x8xf32>, vector<32x8xf32> -> vector<32x8xf32>
    %3 = vector.extract_strided_slice %2 {offsets = [0, 0], sizes = [16, 8], strides = [1, 1]} : vector<32x8xf32> to vector<16x8xf32>
    %4 = arith.mulf %3, %0 : vector<16x8xf32>
    %cst_3 = arith.constant dense<0.000000e+00> : vector<8xf32>
    %5 = vector.multi_reduction <add>, %4, %cst_3 [0] : vector<16x8xf32> to vector<8xf32>
    %6 = vector.shape_cast %5 : vector<8xf32> to vector<1x8xf32>
    %c0_4 = arith.constant 0 : index
    %c0_5 = arith.constant 0 : index
    %7 = memref.load %arg3[%c0_4, %c0_5] : memref<1x2xf32, #tpu.memory_space<smem>>
    %8 = vector.broadcast %7 : f32 to vector<1x8xf32>
    %9 = arith.addf %6, %8 : vector<1x8xf32>
    %10 = vector.extract_strided_slice %2 {offsets = [16, 0], sizes = [16, 8], strides = [1, 1]} : vector<32x8xf32> to vector<16x8xf32>
    %11 = arith.mulf %10, %0 : vector<16x8xf32>
    %cst_6 = arith.constant dense<0.000000e+00> : vector<8xf32>
    %12 = vector.multi_reduction <add>, %11, %cst_6 [0] : vector<16x8xf32> to vector<8xf32>
    %13 = vector.shape_cast %12 : vector<8xf32> to vector<1x8xf32>
    %c0_7 = arith.constant 0 : index
    %c1 = arith.constant 1 : index
    %14 = memref.load %arg3[%c0_7, %c1] : memref<1x2xf32, #tpu.memory_space<smem>>
    %15 = vector.broadcast %14 : f32 to vector<1x8xf32>
    %16 = arith.addf %13, %15 : vector<1x8xf32>
    %17 = arith.mulf %9, %9 : vector<1x8xf32>
    %18 = arith.mulf %9, %16 : vector<1x8xf32>
    %19 = arith.mulf %16, %16 : vector<1x8xf32>
    %c0_8 = arith.constant 0 : index
    %c0_9 = arith.constant 0 : index
    %20 = memref.load %arg4[%c0_8, %c0_9] : memref<4x3xf32, #tpu.memory_space<smem>>
    %21 = vector.broadcast %20 : f32 to vector<1x8xf32>
    %22 = arith.mulf %17, %21 : vector<1x8xf32>
    %c3 = arith.constant 3 : index
    %c0_10 = arith.constant 0 : index
    %23 = memref.load %arg4[%c3, %c0_10] : memref<4x3xf32, #tpu.memory_space<smem>>
    %24 = vector.broadcast %23 : f32 to vector<1x8xf32>
    %25 = arith.addf %22, %24 : vector<1x8xf32>
    %c1_11 = arith.constant 1 : index
    %c0_12 = arith.constant 0 : index
    %26 = memref.load %arg4[%c1_11, %c0_12] : memref<4x3xf32, #tpu.memory_space<smem>>
    %27 = vector.broadcast %26 : f32 to vector<1x8xf32>
    %28 = arith.mulf %18, %27 : vector<1x8xf32>
    %29 = arith.addf %25, %28 : vector<1x8xf32>
    %c2 = arith.constant 2 : index
    %c0_13 = arith.constant 0 : index
    %30 = memref.load %arg4[%c2, %c0_13] : memref<4x3xf32, #tpu.memory_space<smem>>
    %31 = vector.broadcast %30 : f32 to vector<1x8xf32>
    %32 = arith.mulf %19, %31 : vector<1x8xf32>
    %33 = arith.addf %29, %32 : vector<1x8xf32>
    %c0_14 = arith.constant 0 : index
    %c1_15 = arith.constant 1 : index
    %34 = memref.load %arg4[%c0_14, %c1_15] : memref<4x3xf32, #tpu.memory_space<smem>>
    %35 = vector.broadcast %34 : f32 to vector<1x8xf32>
    %36 = arith.mulf %17, %35 : vector<1x8xf32>
    %c3_16 = arith.constant 3 : index
    %c1_17 = arith.constant 1 : index
    %37 = memref.load %arg4[%c3_16, %c1_17] : memref<4x3xf32, #tpu.memory_space<smem>>
    %38 = vector.broadcast %37 : f32 to vector<1x8xf32>
    %39 = arith.addf %36, %38 : vector<1x8xf32>
    %c1_18 = arith.constant 1 : index
    %c1_19 = arith.constant 1 : index
    %40 = memref.load %arg4[%c1_18, %c1_19] : memref<4x3xf32, #tpu.memory_space<smem>>
    %41 = vector.broadcast %40 : f32 to vector<1x8xf32>
    %42 = arith.mulf %18, %41 : vector<1x8xf32>
    %43 = arith.addf %39, %42 : vector<1x8xf32>
    %c2_20 = arith.constant 2 : index
    %c1_21 = arith.constant 1 : index
    %44 = memref.load %arg4[%c2_20, %c1_21] : memref<4x3xf32, #tpu.memory_space<smem>>
    %45 = vector.broadcast %44 : f32 to vector<1x8xf32>
    %46 = arith.mulf %19, %45 : vector<1x8xf32>
    %47 = arith.addf %43, %46 : vector<1x8xf32>
    %c0_22 = arith.constant 0 : index
    %c2_23 = arith.constant 2 : index
    %48 = memref.load %arg4[%c0_22, %c2_23] : memref<4x3xf32, #tpu.memory_space<smem>>
    %49 = vector.broadcast %48 : f32 to vector<1x8xf32>
    %50 = arith.mulf %17, %49 : vector<1x8xf32>
    %c3_24 = arith.constant 3 : index
    %c2_25 = arith.constant 2 : index
    %51 = memref.load %arg4[%c3_24, %c2_25] : memref<4x3xf32, #tpu.memory_space<smem>>
    %52 = vector.broadcast %51 : f32 to vector<1x8xf32>
    %53 = arith.addf %50, %52 : vector<1x8xf32>
    %c1_26 = arith.constant 1 : index
    %c2_27 = arith.constant 2 : index
    %54 = memref.load %arg4[%c1_26, %c2_27] : memref<4x3xf32, #tpu.memory_space<smem>>
    %55 = vector.broadcast %54 : f32 to vector<1x8xf32>
    %56 = arith.mulf %18, %55 : vector<1x8xf32>
    %57 = arith.addf %53, %56 : vector<1x8xf32>
    %c2_28 = arith.constant 2 : index
    %c2_29 = arith.constant 2 : index
    %58 = memref.load %arg4[%c2_28, %c2_29] : memref<4x3xf32, #tpu.memory_space<smem>>
    %59 = vector.broadcast %58 : f32 to vector<1x8xf32>
    %60 = arith.mulf %19, %59 : vector<1x8xf32>
    %61 = arith.addf %57, %60 : vector<1x8xf32>
    %62 = tpu.concatenate %33, %47, %61 in 0 : vector<1x8xf32>, vector<1x8xf32>, vector<1x8xf32> -> vector<3x8xf32>
    %cst_30 = arith.constant 0.000000e+00 : f32
    %63 = vector.broadcast %cst_30 : f32 to vector<3x8xf32>
    %64 = arith.subf %63, %62 : vector<3x8xf32>
    %65 = math.exp %64 : vector<3x8xf32>
    %cst_31 = arith.constant 1.000000e+00 : f32
    %66 = vector.broadcast %cst_31 : f32 to vector<3x8xf32>
    %67 = arith.addf %66, %65 : vector<3x8xf32>
    %cst_32 = arith.constant 1.000000e+00 : f32
    %68 = vector.broadcast %cst_32 : f32 to vector<3x8xf32>
    %69 = arith.divf %68, %67 : vector<3x8xf32>
    %c0_33 = arith.constant 0 : index
    %c0_34 = arith.constant 0 : index
    %70 = vector.load %arg5[%c0_33, %c0_34] : memref<3x8xf32, #tpu.memory_space<vmem>>, vector<3x8xf32>
    tpu.vector_store %arg5[%c0_33, %c0_34], %69 {strides = array<i32>} : memref<3x8xf32, #tpu.memory_space<vmem>>, vector<3x8xf32>,
    return
  }
  func.func @transform_0(%arg0: i32) -> (i32, i32) {
    %c0_i32 = arith.constant 0 : i32
    %c0_i32_0 = arith.constant 0 : i32
    return %c0_i32, %arg0 : i32, i32
  }
  func.func @transform_1(%arg0: i32) -> (i32, i32) {
    %c0_i32 = arith.constant 0 : i32
    %c0_i32_0 = arith.constant 0 : i32
    %c0_i32_1 = arith.constant 0 : i32
    return %c0_i32, %c0_i32_0 : i32, i32
  }
  func.func @transform_2(%arg0: i32) -> (i32, i32) {
    %c0_i32 = arith.constant 0 : i32
    %c0_i32_0 = arith.constant 0 : i32
    %c0_i32_1 = arith.constant 0 : i32
    return %c0_i32, %c0_i32_0 : i32, i32
  }
  func.func @transform_3(%arg0: i32) -> (i32, i32) {
    %c0_i32 = arith.constant 0 : i32
    %c0_i32_0 = arith.constant 0 : i32
    %c0_i32_1 = arith.constant 0 : i32
    return %c0_i32, %c0_i32_0 : i32, i32
  }
  func.func @transform_4(%arg0: i32) -> (i32, i32) {
    %c0_i32 = arith.constant 0 : i32
    %c0_i32_0 = arith.constant 0 : i32
    return %c0_i32, %arg0 : i32, i32
  }
}

</mosaic_0001>

<bundles_post_ra>
// kernel: logistic_regression_forward.1
= control target key start
LH: loop header
LB: loop body
LE: loop exit
PB: predicated region body
PF: predicated region fallthrough
CT: control target
= control target key end

     0   :  { %9 = vsyncpa [#allocation4], 0  ;;  %s446_s0 = inlined_call_operand.vmem [shape: f32[16,8], index: 0, kind: input, shape index: {}]   ;;  %s447_s1 = inlined_call_operand.vmem [shape: f32[32,16], index: 1, kind: input, shape index: {}]   ;;  %s448_s2 = inlined_call_operand.vmem [shape: f32[1,2], index: 2, kind: input, shape index: {}]   ;;  %s449_s3 = inlined_call_operand.vmem [shape: f32[4,3], index: 3, kind: input, shape index: {}]   ;;  %s450_s4 = inlined_call_operand.hbm [shape: f32[3,8], index: 4, kind: output, shape index: {}]  }
   0x1   :  { %10 = vsyncpa [#allocation6], 0 }
   0x2   :  { %11 = vsyncpa [#allocation3], 0  ;;  %s22_s17 = sshll.u32 %s448_s2, 4  ;;  %s32_s20 = sshll.u32 %s449_s3, 4  ;;  %s23_s17 = int_to_ptr.vmem [resolvable:$true] %s22_s17  ;;  %s33_s20 = int_to_ptr.vmem [resolvable:$true] %s32_s20 }
   0x3   :  { %s294_s21 = scalar_lea.vmem %s23_s17, 16  ;;  %p299_p1 = scmp.lt.s32.totalorder %s23_s17, %s23_s17 }
   0x4   :  { %p295_p0 = scmp.ne.s32.totalorder %s23_s17, %s294_s21  ;;  %p300_p2 = scmp.lt.s32.totalorder %s294_s21, %s294_s21 }
   0x6   :  { %p301_p3 = por %p300_p2, %p299_p1 }
   0x8   :  { %p302_p4 = pnand %p301_p3, %p295_p0 }
   0xa   :  { %305 = shalt.err (!%p302_p4)
}
   0xb   :  { %s346_s22 = smov [#allocation2]   ;;  %s306_s23 = scalar_lea.vmem %s33_s20, 64 }
   0xc   :  { %25 = dma.vmem_to_smem %s23_s17, 16, %s346_s22, [#allocation4]  }
   0xd   :  { %p307_p5 = scmp.ne.s32.totalorder %s33_s20, %s306_s23  ;;  %p311_p6 = scmp.lt.s32.totalorder %s33_s20, %s33_s20 }
   0xe   :  { %p312_p7 = scmp.lt.s32.totalorder %s306_s23, %s306_s23 }
  0x10   :  { %p313_p8 = por %p312_p7, %p311_p6 }
  0x12   :  { %p314_p9 = pnand %p313_p8, %p307_p5 }
  0x14   :  { %317 = shalt.err (!%p314_p9)
}
  0x15   :  { %s347_s2 = smov [#allocation5]  }
  0x16   :  { %35 = dma.vmem_to_smem %s33_s20, 64, %s347_s2, [#allocation6]  }
  0x17   :  { %340 = dma.done.wait [#allocation4], 16  }
  0x18   :  { %341 = vsyncadd [#allocation4], 4294967280 }
  0x19   :  { %342 = dma.done.wait [#allocation6], 64  }
  0x1a   :  { %343 = vsyncadd [#allocation6], 4294967232 }
  0x1b   :  { %42 = sfence }
  0x1c   :  { %v43_v0 = vld [vmem:[%s446_s0] sm:$0xff]  ;;  %v44_v1 = vld [vmem:[%s446_s0 + $0x8] sm:$0xff]  ;;  %vm49_vm0 = vcmask 130048   ;;  %v47_v4 = vld [vmem:[%s447_s1 + $0x10] sm:$0xff]  ;;  %vm149_vm1 = vcmask 64512   ;;  %s253_s8 = sld [smem:[#allocation2 + $0x1]] }
  0x1d   :  { %v45_v2 = vld [vmem:[%s447_s1] sm:$0xff]  ;;  %v281_v3 = vpack.c.bf16 %v44_v1, %v43_v0  ;;  %278 = vmatprep.mubr.msk.f32.mxu1 %vm49_vm0, %v47_v4  ;;  %v46_v5 = vld [vmem:[%s447_s1 + $0x8] sm:$0xff]  ;;  %v48_v6 = vld [vmem:[%s447_s1 + $0x18] sm:$0xff]  ;;  %s159_s1 = sld [smem:[#allocation2]]  ;;  %s400_s10 = sld [smem:[#allocation5 + $0x1]]  ;;  %vm221_vm2 = vcmask 1040384  }
  0x1e   :  { %275 = vmatprep.mubr.msk.f32.mxu0 %vm49_vm0, %v45_v2  ;;  %s398_s9 = sld [smem:[#allocation5]]  ;;  %s402_s11 = sld [smem:[#allocation5 + $0x2]]  ;;  %vm223_vm3 = vcmask 1041408   ;;  %vm231_vm4 = vcmask 59392  }
  0x1f   :  { %282 = vmatprep.subr.bf16.mxu0 %v281_v3  ;;  %285 = vmatprep.subr.bf16.mxu1 %v281_v3  ;;  %s404_s12 = sld [smem:[#allocation5 + $0x80]]  ;;  %s408_s14 = sld [smem:[#allocation5 + $0x181]] }
  0x20   :  { %284 = vmatpush3.bf16.msra.mxu0 %v281_v3  ;;  %286 = vmatpush3.bf16.msra.mxu1 %v281_v3  ;;  %s406_s13 = sld [smem:[#allocation5 + $0x180]]  ;;  %s410_s15 = sld [smem:[#allocation5 + $0x182]] }
  0x21   :  { %s412_s16 = sld [smem:[#allocation5 + $0x81]]  ;;  %s414_s17 = sld [smem:[#allocation5 + $0x100]] }
  0x22   :  { %s416_s18 = sld [smem:[#allocation5 + $0x82]]  ;;  %s418_s19 = sld [smem:[#allocation5 + $0x101]]  ;;  %v174_v32 = vstv %s253_s8 }
  0x23   :  { %276 = vmatmul.mubr.msk.f32.vlgmr.msra.gmra.mrb[0].mxu0 %vm49_vm0, %v46_v5  ;;  %279 = vmatmul.mubr.msk.f32.vlgmr.msra.gmra.mrb[0].mxu1 %vm49_vm0, %v48_v6  ;;  %v160_v31 = vstv %s159_s1  ;;  %s420_s20 = sld [smem:[#allocation5 + $0x102]]  ;;  %v194_v39 = vstv %s400_s10  ;;  %s348_s21 = smov [#allocation7]  }
  0x24   :  { %v180_v36 = vstv %s398_s9  ;;  %v208_v40 = vstv %s402_s11  ;;  %s239_s22 = sshll.u32 %s348_s21, 4  ;;  %s240_s22 = int_to_ptr.vmem [resolvable:$true] %s239_s22 }
  0x25   :  { %v186_v41 = vstv %s404_s12  ;;  %v197_v43 = vstv %s408_s14  ;;  %s318_s23 = scalar_lea.vmem %s240_s22, 64  ;;  %p323_p11 = scmp.lt.s32.totalorder %s240_s22, %s240_s22 }
  0x26   :  { %v183_v38 = vstv %s406_s13  ;;  %v211_v46 = vstv %s410_s15  ;;  %p319_p10 = scmp.ne.s32.totalorder %s240_s22, %s318_s23  ;;  %p324_p12 = scmp.lt.s32.totalorder %s318_s23, %s318_s23 }
  0x27   :  { %v200_v45 = vstv %s412_s16  ;;  %v190_v48 = vstv %s414_s17 }
  0x28   :  { %v214_v49 = vstv %s416_s18  ;;  %v204_v53 = vstv %s418_s19  ;;  %p325_p13 = por %p324_p12, %p323_p11 }
  0x29   :  { %v218_v56 = vstv %s420_s20 }
  0x2a   :  { %p326_p0 = pnand %p325_p13, %p319_p10 }
  0xf6   :  { %v277_v7 = vpop.f32.mrb[0].mxu0  ;;  %v280_v8 = vpop.f32.mrb[0].mxu1 }
  0xf7   :  { %v148_v9 = vmul.f32 %v277_v7, %v44_v1  ;;  %v163_v10 = vmul.f32 %v280_v8, %v44_v1  ;;  %v128_v11 = vpop.f32.mrb[1].mxu0  ;;  %v138_v12 = vpop.f32.mrb[1].mxu1 }
  0xf8   :  { %v147_v13 = vmul.f32 %v128_v11, %v43_v0  ;;  %v162_v14 = vmul.f32 %v138_v12, %v43_v0 }
  0xf9   :  { %v151_v15 = vsel %vm149_vm1, %v148_v9, 0.0  ;;  %v165_v16 = vsel %vm149_vm1, %v163_v10, 0.0 }
  0xfa   :  { %v150_v17 = vsel %vm149_vm1, %v147_v13, 0.0  ;;  %v164_v18 = vsel %vm149_vm1, %v162_v14, 0.0 }
  0xfb   :  { %v152_v19 = vadd.f32 %v151_v15, %v150_v17  ;;  %v166_v20 = vadd.f32 %v165_v16, %v164_v18 }
  0xfd   :  { %v153_v21 = vrot.slane %v152_v19, 4  ;;  %v167_v22 = vrot.slane %v166_v20, 4 }
  0xff   :  { %v154_v23 = vadd.f32 %v153_v21, %v152_v19  ;;  %v168_v24 = vadd.f32 %v167_v22, %v166_v20 }
 0x101   :  { %v155_v25 = vrot.slane %v154_v23, 2  ;;  %v169_v26 = vrot.slane %v168_v24, 2 }
 0x103   :  { %v156_v27 = vadd.f32 %v155_v25, %v154_v23  ;;  %v170_v28 = vadd.f32 %v169_v26, %v168_v24 }
 0x105   :  { %v157_v29 = vrot.slane %v156_v27, 1  ;;  %v171_v30 = vrot.slane %v170_v28, 1 }
 0x107   :  { %v158_v33 = vadd.f32 %v157_v29, %v156_v27  ;;  %v172_v34 = vadd.f32 %v171_v30, %v170_v28 }
 0x109   :  { %v161_v35 = vadd.f32 %v160_v31, %v158_v33  ;;  %v175_v37 = vadd.f32 %v174_v32, %v172_v34 }
 0x10b   :  { %v176_v42 = vmul.f32 %v161_v35, %v161_v35  ;;  %v177_v44 = vmul.f32 %v175_v37, %v161_v35  ;;  %v178_v47 = vmul.f32 %v175_v37, %v175_v37 }
 0x10d   :  { %v181_v50 = vmul.f32 %v180_v36, %v176_v42  ;;  %v195_v51 = vmul.f32 %v194_v39, %v176_v42  ;;  %v209_v52 = vmul.f32 %v208_v40, %v176_v42  ;;  %v187_v54 = vmul.f32 %v186_v41, %v177_v44 }
 0x10e   :  { %v201_v55 = vmul.f32 %v200_v45, %v177_v44  ;;  %v215_v60 = vmul.f32 %v214_v49, %v177_v44  ;;  %v191_v61 = vmul.f32 %v190_v48, %v178_v47  ;;  %v205_v62 = vmul.f32 %v204_v53, %v178_v47 }
 0x10f   :  { %v184_v57 = vadd.f32 %v183_v38, %v181_v50  ;;  %v198_v58 = vadd.f32 %v197_v43, %v195_v51  ;;  %v212_v59 = vadd.f32 %v211_v46, %v209_v52  ;;  %v219_v2 = vmul.f32 %v218_v56, %v178_v47 }
 0x111   :  { %v188_v63 = vadd.f32 %v187_v54, %v184_v57  ;;  %v202_v0 = vadd.f32 %v201_v55, %v198_v58  ;;  %v216_v1 = vadd.f32 %v215_v60, %v212_v59 }
 0x113   :  { %v192_v3 = vadd.f32 %v191_v61, %v188_v63  ;;  %v206_v4 = vadd.f32 %v205_v62, %v202_v0  ;;  %v220_v5 = vadd.f32 %v219_v2, %v216_v1 }
 0x115   :  { %v222_v6 = vsel %vm221_vm2, %v192_v3, %v206_v4 }
 0x116   :  { %v224_v7 = vsel %vm223_vm3, %v222_v6, %v220_v5 }
 0x117   :  { %v225_v8 = vsub.f32 0.0, %v224_v7 }
 0x119   :  { %v226_v9 = vmul.f32 1.442695, %v225_v8 }
 0x11b   :  { %290 = vpow2.f32 %v226_v9 }
 0x125   :  { %v291_v10 = vpop.eup %290 }
 0x126   :  { %v228_v11 = vadd.f32 1.0, %v291_v10 }
 0x128   :  { %292 = vrcp.f32 %v228_v11 }
 0x132   :  { %v293_v12 = vpop.eup %292 }
 0x133   :  { %232 = vst.msk [vmem:[#allocation7] sm:$0x7] %vm231_vm4, %v293_v12 }
 0x134   :  { %329 = shalt.err (!%p326_p0)
}
 0x135   :  { %s330_s24 = scalar_lea.hbm %s450_s4, 64 }
 0x136   :  { %p331_p1 = scmp.ne.s32.totalorder %s450_s4, %s330_s24  ;;  %p334_p2 = scmp.lt.u32.totalorder %s330_s24, %s450_s4 }
 0x138   :  { %p336_p3 = pnand %p334_p2, %p331_p1 }
 0x13a   :  { %339 = shalt.err (!%p336_p3)
}
 0x13b   :  { %242 = dma.vmem_to_hbm [thread:$0]  %s240_s22, 64, %s450_s4, [#allocation3]  }
 0x13c   :  { %344 = dma.done.wait [#allocation3], 64  }
 0x13d   :  { %345 = vsyncadd [#allocation3], 4294967232 }
 0x13e   :  { %246 = vsyncpa [#allocation3], 1 }
 0x13f   :  { %247 = vsyncpa [#allocation4], 1 }
 0x140   :  { %248 = vsyncpa [#allocation6], 1 }

</bundles_post_ra>
